<compile_context>
chip_gen: v7x
topology: tpu7x:2x2x1
jax: 0.10.0
libtpu: 0.0.40
codegen_flags: <defaults>
</compile_context>

<pallas_src>
import math
import functools

import jax
import jax.numpy as jnp
from jax.experimental import pallas as pl
from jax.experimental.pallas import tpu as pltpu

SQRT_2_OVER_PI = math.sqrt(2.0 / math.pi)


def _gelu(x):
    # BERT/GPT tanh GELU -- identical to the module's custom GELU class.
    return 0.5 * x * (1.0 + jnp.tanh(SQRT_2_OVER_PI * (x + 0.044715 * (x * x * x))))


def encoder_block_kernel(x_ref, w1_ref, b1_ref, w2_ref, b2_ref, w3_ref, b3_ref,
                         out_ref, *, H, K, Hpa, WCg):
    """One grid step: Bt images, 3 fused conv(+bias)+GELU stages on the MXU.

    x_ref  : (Bt, Hpa, WCg) f32   row-padded input, channels packed into lanes
    w*_ref : (K, WCg, WCg)  bf16  banded per-row-tap weight matrices
    b*_ref : (1, WCg)       f32   bias replicated over the W positions
    out_ref: (Bt, Hpa, WCg) f32   output in the same row-padded layout
    """
    p = K // 2
    Bt = out_ref.shape[0]
    M = Bt * Hpa

    # Rows [p, p+H) of each image hold data; every other row is the 'same'
    # zero row-padding of the NEXT conv and must be forced back to zero.
    row = jax.lax.broadcasted_iota(jnp.int32, (M, WCg), 0) % Hpa
    valid = (row >= p) & (row < p + H)

    def shift_rows(r, s):
        # result[i] = r[i - s], zero-filled at the edges (s in {-p .. p}).
        if s == 0:
            return r
        z = jnp.zeros((abs(s), WCg), jnp.float32)
        if s > 0:
            return jnp.concatenate([z, r[:M - s]], axis=0)
        return jnp.concatenate([r[-s:], z], axis=0)

    def stage(x_f32, w_ref, b_ref):
        lhs = x_f32.astype(jnp.bfloat16)                  # bf16 MXU operand
        acc = None
        for dy in range(K):                               # K band matmuls / stage
            r = jnp.dot(lhs, w_ref[dy], preferred_element_type=jnp.float32)
            r = shift_rows(r, p - dy)                     # row-tap alignment
            acc = r if acc is None else acc + r
        acc = acc + b_ref[...]                            # (1, WCg) broadcast
        return jnp.where(valid, _gelu(acc), 0.0)          # f32 GELU, re-zero pads

    x1 = x_ref[...].reshape(M, WCg)
    h1 = stage(x1, w1_ref, b1_ref)
    h2 = stage(h1, w2_ref, b2_ref)
    h3 = stage(h2, w3_ref, b3_ref)
    out_ref[...] = h3.reshape(Bt, Hpa, WCg)               # aligned 128-lane store


def _band_weights(w, b, Cg, W, K):
    """Banded lane-space weight matrix + lane-replicated bias for one stage.

    w: (K, K, cin, cout) HWIO, b: (cout,) ->
      band[dy, x_in*Cg+ci, x_out*Cg+co] = w[dy, dx, ci, co] with
      dx = x_in - x_out + K//2 (zero outside the band / outside cin,cout),
      returned as bf16 (K, W*Cg, W*Cg);  bias as f32 (1, W*Cg).
    """
    _, _, cin, cout = w.shape
    p = K // 2
    WCg = W * Cg

    wp = jnp.zeros((K, K, Cg, Cg), jnp.float32).at[:, :, :cin, :cout].set(
        w.astype(jnp.float32))

    lane = jnp.arange(WCg)
    x_in, ci = lane // Cg, lane % Cg
    x_out, co = lane // Cg, lane % Cg
    dx = x_in[:, None] - x_out[None, :] + p                 # (WCg, WCg)
    in_band = (dx >= 0) & (dx < K)
    dxc = jnp.clip(dx, 0, K - 1)
    band = wp[:, dxc, ci[:, None], co[None, :]]             # (K, WCg, WCg)
    band = jnp.where(in_band[None], band, 0.0)

    bias = jnp.zeros((Cg,), jnp.float32).at[:cout].set(b.astype(jnp.float32))
    bias_row = jnp.tile(bias, W)[None, :]                   # (1, WCg)
    return band.astype(jnp.bfloat16), bias_row


def encoder_block(x_nchw, params, kernel_size):
    """PyTorch-equivalent forward. x_nchw: (B, Cin, H, W) -> (B, Cout, H, W)."""
    w1, b1, w2, b2, w3, b3 = params
    B, Cin, H, W = x_nchw.shape
    Cout = w1.shape[-1]
    K = kernel_size
    p = K // 2

    Cg = max(8, Cin, Cout)                        # lane channel-group size
    WCg = W * Cg                                  # lane width (128 here)
    Hpa = ((H + 2 * p + 7) // 8) * 8              # sublane-aligned padded rows

    # Even grid with >= 2 steps keeps both v7x TensorCores busy and balanced;
    # <= 8 images per block keeps the stacked matmul M = Bt*Hpa modest.
    blocks = max(2, 2 * math.ceil(B / 16))
    Bt = math.ceil(B / blocks)
    Bpad = blocks * Bt

    # Wrapper-side layout prep (free XLA work): NCHW -> NHWC, zero-pad channels
    # to Cg and interleave into lanes, zero-pad rows to Hpa ('same' + align).
    x = jnp.transpose(x_nchw, (0, 2, 3, 1)).astype(jnp.float32)     # (B,H,W,Cin)
    x = jnp.pad(x, ((0, Bpad - B), (0, 0), (0, 0), (0, Cg - Cin)))  # (Bpad,H,W,Cg)
    x = x.reshape(Bpad, H, WCg)
    x_pad = jnp.pad(x, ((0, 0), (p, Hpa - H - p), (0, 0)))          # (Bpad,Hpa,WCg)

    w1t, b1t = _band_weights(w1, b1, Cg, W, K)
    w2t, b2t = _band_weights(w2, b2, Cg, W, K)
    w3t, b3t = _band_weights(w3, b3, Cg, W, K)

    kernel = functools.partial(encoder_block_kernel, H=H, K=K, Hpa=Hpa, WCg=WCg)

    out_pad = pl.pallas_call(
        kernel,
        out_shape=jax.ShapeDtypeStruct((Bpad, Hpa, WCg), jnp.float32),
        grid_spec=pltpu.PrefetchScalarGridSpec(
            num_scalar_prefetch=0,
            grid=(Bpad // Bt,),
            in_specs=[
                pl.BlockSpec((Bt, Hpa, WCg), lambda g: (g, 0, 0)),
                pl.BlockSpec((K, WCg, WCg), lambda g: (0, 0, 0)),
                pl.BlockSpec((1, WCg), lambda g: (0, 0)),
                pl.BlockSpec((K, WCg, WCg), lambda g: (0, 0, 0)),
                pl.BlockSpec((1, WCg), lambda g: (0, 0)),
                pl.BlockSpec((K, WCg, WCg), lambda g: (0, 0, 0)),
                pl.BlockSpec((1, WCg), lambda g: (0, 0)),
            ],
            out_specs=pl.BlockSpec((Bt, Hpa, WCg), lambda g: (g, 0, 0)),
        ),
        compiler_params=pltpu.CompilerParams(dimension_semantics=("parallel",)),
    )(x_pad, w1t, b1t, w2t, b2t, w3t, b3t)

    out = out_pad[:B, p:p + H, :].reshape(B, H, W, Cg)[..., :Cout]
    return jnp.transpose(out, (0, 3, 1, 2))                          # NCHW


def _reference_forward(x_nchw, params):
    """Pure-JAX reference (lax conv, f32, HIGHEST precision)."""
    w1, b1, w2, b2, w3, b3 = params
    dn = ('NHWC', 'HWIO', 'NHWC')

    def conv(a, w, b):
        y = jax.lax.conv_general_dilated(a, w, (1, 1), 'SAME', dimension_numbers=dn,
                                         precision=jax.lax.Precision.HIGHEST)
        return y + b[None, None, None, :]

    def g(t):
        return 0.5 * t * (1.0 + jnp.tanh(SQRT_2_OVER_PI * (t + 0.044715 * t ** 3)))

    h = jnp.transpose(x_nchw, (0, 2, 3, 1)).astype(jnp.float32)
    h = g(conv(h, w1, b1))
    h = g(conv(h, w2, b2))
    h = g(conv(h, w3, b3))
    return jnp.transpose(h, (0, 3, 1, 2))


if __name__ == "__main__":
    B, Cin, Cout, H, W, K = 2, 4, 8, 16, 16, 3

    key = jax.random.PRNGKey(0)
    ks = jax.random.split(key, 7)
    x = jax.random.normal(ks[0], (B, Cin, H, W), jnp.float32)

    # Deterministic parameter init (uniform, PyTorch-Conv2d-like fan-in bounds).
    bound1 = 1.0 / math.sqrt(Cin * K * K)
    bound2 = 1.0 / math.sqrt(Cout * K * K)
    w1 = jax.random.uniform(ks[1], (K, K, Cin, Cout), jnp.float32, -bound1, bound1)
    b1 = jax.random.uniform(ks[2], (Cout,), jnp.float32, -bound1, bound1)
    w2 = jax.random.uniform(ks[3], (K, K, Cout, Cout), jnp.float32, -bound2, bound2)
    b2 = jax.random.uniform(ks[4], (Cout,), jnp.float32, -bound2, bound2)
    w3 = jax.random.uniform(ks[5], (K, K, Cout, Cout), jnp.float32, -bound2, bound2)
    b3 = jax.random.uniform(ks[6], (Cout,), jnp.float32, -bound2, bound2)
    params = (w1, b1, w2, b2, w3, b3)

    fwd = jax.jit(functools.partial(encoder_block, kernel_size=K))
    out = jax.block_until_ready(fwd(x, params))

    ref = _reference_forward(x, params)
    assert out.shape == (B, Cout, H, W), out.shape
    max_err = float(jnp.max(jnp.abs(out - ref)))
    if max_err < 1e-2:
        print("KERNEL_OK")
    else:
        print(f"MISMATCH max_abs_err={max_err}")
</pallas_src>

<mosaic_0001>
module attributes {stable_mosaic.version = 11 : i64} {
  func.func @encoder_block_kernel(%arg0: i32, %arg1: memref<1x24x128xf32, #tpu.memory_space<vmem>>, %arg2: memref<3x128x128xbf16, #tpu.memory_space<vmem>>, %arg3: memref<1x128xf32, #tpu.memory_space<vmem>>, %arg4: memref<3x128x128xbf16, #tpu.memory_space<vmem>>, %arg5: memref<1x128xf32, #tpu.memory_space<vmem>>, %arg6: memref<3x128x128xbf16, #tpu.memory_space<vmem>>, %arg7: memref<1x128xf32, #tpu.memory_space<vmem>>, %arg8: memref<1x24x128xf32, #tpu.memory_space<vmem>>) attributes {dimension_semantics = [#tpu.dimension_semantics<parallel>], iteration_bounds = array<i64: 2>, scalar_prefetch = 0 : i64, scratch_operands = 0 : i64, tpu.core_type = #tpu.core_type<tc>, window_params = [{transform_indices = @transform_0, window_bounds = array<i64: 1, 24, 128>}, {pipeline_mode = #tpu.pipeline_mode<synchronous>, transform_indices = @transform_1, window_bounds = array<i64: 3, 128, 128>}, {pipeline_mode = #tpu.pipeline_mode<synchronous>, transform_indices = @transform_2, window_bounds = array<i64: 1, 128>}, {pipeline_mode = #tpu.pipeline_mode<synchronous>, transform_indices = @transform_3, window_bounds = array<i64: 3, 128, 128>}, {pipeline_mode = #tpu.pipeline_mode<synchronous>, transform_indices = @transform_4, window_bounds = array<i64: 1, 128>}, {pipeline_mode = #tpu.pipeline_mode<synchronous>, transform_indices = @transform_5, window_bounds = array<i64: 3, 128, 128>}, {pipeline_mode = #tpu.pipeline_mode<synchronous>, transform_indices = @transform_6, window_bounds = array<i64: 1, 128>}, {transform_indices = @transform_7, window_bounds = array<i64: 1, 24, 128>}]} {
    %0 = tpu.iota {dimensions = array<i32: 0>} : vector<24x128xi32>
    %c24_i32 = arith.constant 24 : i32
    %c0_i32 = arith.constant 0 : i32
    %1 = arith.cmpi eq, %c24_i32, %c0_i32 : i32
    %c1_i32 = arith.constant 1 : i32
    %2 = arith.select %1, %c1_i32, %c24_i32 : i32
    %3 = vector.broadcast %2 : i32 to vector<24x128xi32>
    %4 = arith.remsi %0, %3 : vector<24x128xi32>
    %c0_i32_0 = arith.constant 0 : i32
    %5 = vector.broadcast %c0_i32_0 : i32 to vector<24x128xi32>
    %6 = arith.cmpi ne, %4, %5 : vector<24x128xi32>
    %c0_i32_1 = arith.constant 0 : i32
    %7 = vector.broadcast %c0_i32_1 : i32 to vector<24x128xi32>
    %8 = arith.cmpi slt, %4, %7 : vector<24x128xi32>
    %c0_i32_2 = arith.constant 0 : i32
    %9 = arith.cmpi slt, %2, %c0_i32_2 : i32
    %10 = vector.broadcast %9 : i1 to vector<24x128xi1>
    %11 = vector.broadcast %10 : vector<24x128xi1> to vector<24x128xi1>
    %12 = arith.xori %8, %11 : vector<24x128xi1>
    %13 = arith.andi %12, %6 : vector<24x128xi1>
    %14 = vector.broadcast %2 : i32 to vector<24x128xi32>
    %15 = arith.addi %4, %14 : vector<24x128xi32>
    %16 = arith.select %13, %15, %4 : vector<24x128xi1>, vector<24x128xi32>
    %c1_i32_3 = arith.constant 1 : i32
    %17 = vector.broadcast %c1_i32_3 : i32 to vector<24x128xi32>
    %18 = arith.cmpi sge, %16, %17 : vector<24x128xi32>
    %c17_i32 = arith.constant 17 : i32
    %19 = vector.broadcast %c17_i32 : i32 to vector<24x128xi32>
    %20 = arith.cmpi slt, %16, %19 : vector<24x128xi32>
    %21 = arith.andi %18, %20 : vector<24x128xi1>
    %c0 = arith.constant 0 : index
    %c0_4 = arith.constant 0 : index
    %c0_5 = arith.constant 0 : index
    %22 = vector.load %arg1[%c0, %c0_4, %c0_5] : memref<1x24x128xf32, #tpu.memory_space<vmem>>, vector<1x24x128xf32>
    %23 = vector.shape_cast %22 : vector<1x24x128xf32> to vector<24x128xf32>
    %24 = arith.truncf %23 : vector<24x128xf32> to vector<24x128xbf16>
    %c0_6 = arith.constant 0 : index
    %c0_7 = arith.constant 0 : index
    %c0_8 = arith.constant 0 : index
    %25 = vector.load %arg2[%c0_6, %c0_7, %c0_8] : memref<3x128x128xbf16, #tpu.memory_space<vmem>>, vector<1x128x128xbf16>
    %26 = vector.shape_cast %25 : vector<1x128x128xbf16> to vector<128x128xbf16>
    %cst = arith.constant dense<0.000000e+00> : vector<24x128xf32>
    %27 = tpu.matmul %24, %26, %cst {dimension_numbers = #tpu.dot_dimension_numbers<[1], [0], [0], [1], [0, 0, 1, 1], [], []>} : vector<24x128xbf16>, vector<128x128xbf16>, vector<24x128xf32> -> vector<24x128xf32>
    %cst_9 = arith.constant 0.000000e+00 : f32
    %28 = vector.broadcast %cst_9 : f32 to vector<1x128xf32>
    %29 = vector.extract_strided_slice %27 {offsets = [0, 0], sizes = [23, 128], strides = [1, 1]} : vector<24x128xf32> to vector<23x128xf32>
    %30 = tpu.concatenate %28, %29 in 0 : vector<1x128xf32>, vector<23x128xf32> -> vector<24x128xf32>
    %c1 = arith.constant 1 : index
    %c0_10 = arith.constant 0 : index
    %c0_11 = arith.constant 0 : index
    %31 = vector.load %arg2[%c1, %c0_10, %c0_11] : memref<3x128x128xbf16, #tpu.memory_space<vmem>>, vector<1x128x128xbf16>
    %32 = vector.shape_cast %31 : vector<1x128x128xbf16> to vector<128x128xbf16>
    %cst_12 = arith.constant dense<0.000000e+00> : vector<24x128xf32>
    %33 = tpu.matmul %24, %32, %cst_12 {dimension_numbers = #tpu.dot_dimension_numbers<[1], [0], [0], [1], [0, 0, 1, 1], [], []>} : vector<24x128xbf16>, vector<128x128xbf16>, vector<24x128xf32> -> vector<24x128xf32>
    %34 = arith.addf %30, %33 : vector<24x128xf32>
    %c2 = arith.constant 2 : index
    %c0_13 = arith.constant 0 : index
    %c0_14 = arith.constant 0 : index
    %35 = vector.load %arg2[%c2, %c0_13, %c0_14] : memref<3x128x128xbf16, #tpu.memory_space<vmem>>, vector<1x128x128xbf16>
    %36 = vector.shape_cast %35 : vector<1x128x128xbf16> to vector<128x128xbf16>
    %cst_15 = arith.constant dense<0.000000e+00> : vector<24x128xf32>
    %37 = tpu.matmul %24, %36, %cst_15 {dimension_numbers = #tpu.dot_dimension_numbers<[1], [0], [0], [1], [0, 0, 1, 1], [], []>} : vector<24x128xbf16>, vector<128x128xbf16>, vector<24x128xf32> -> vector<24x128xf32>
    %cst_16 = arith.constant 0.000000e+00 : f32
    %38 = vector.broadcast %cst_16 : f32 to vector<1x128xf32>
    %39 = vector.extract_strided_slice %37 {offsets = [1, 0], sizes = [23, 128], strides = [1, 1]} : vector<24x128xf32> to vector<23x128xf32>
    %40 = tpu.concatenate %39, %38 in 0 : vector<23x128xf32>, vector<1x128xf32> -> vector<24x128xf32>
    %41 = arith.addf %34, %40 : vector<24x128xf32>
    %c0_17 = arith.constant 0 : index
    %c0_18 = arith.constant 0 : index
    %42 = vector.load %arg3[%c0_17, %c0_18] : memref<1x128xf32, #tpu.memory_space<vmem>>, vector<1x128xf32>
    %43 = vector.broadcast %42 : vector<1x128xf32> to vector<24x128xf32>
    %44 = arith.addf %41, %43 : vector<24x128xf32>
    %cst_19 = arith.constant 5.000000e-01 : f32
    %45 = vector.broadcast %cst_19 : f32 to vector<24x128xf32>
    %46 = arith.mulf %45, %44 : vector<24x128xf32>
    %47 = arith.mulf %44, %44 : vector<24x128xf32>
    %48 = arith.mulf %47, %44 : vector<24x128xf32>
    %cst_20 = arith.constant 4.471500e-02 : f32
    %49 = vector.broadcast %cst_20 : f32 to vector<24x128xf32>
    %50 = arith.mulf %49, %48 : vector<24x128xf32>
    %51 = arith.addf %44, %50 : vector<24x128xf32>
    %cst_21 = arith.constant 0.797884583 : f32
    %52 = vector.broadcast %cst_21 : f32 to vector<24x128xf32>
    %53 = arith.mulf %52, %51 : vector<24x128xf32>
    %54 = math.tanh %53 : vector<24x128xf32>
    %cst_22 = arith.constant 1.000000e+00 : f32
    %55 = vector.broadcast %cst_22 : f32 to vector<24x128xf32>
    %56 = arith.addf %55, %54 : vector<24x128xf32>
    %57 = arith.mulf %46, %56 : vector<24x128xf32>
    %cst_23 = arith.constant 0.000000e+00 : f32
    %58 = vector.broadcast %cst_23 : f32 to vector<24x128xf32>
    %59 = arith.select %21, %57, %58 : vector<24x128xi1>, vector<24x128xf32>
    %60 = arith.truncf %59 : vector<24x128xf32> to vector<24x128xbf16>
    %c0_24 = arith.constant 0 : index
    %c0_25 = arith.constant 0 : index
    %c0_26 = arith.constant 0 : index
    %61 = vector.load %arg4[%c0_24, %c0_25, %c0_26] : memref<3x128x128xbf16, #tpu.memory_space<vmem>>, vector<1x128x128xbf16>
    %62 = vector.shape_cast %61 : vector<1x128x128xbf16> to vector<128x128xbf16>
    %cst_27 = arith.constant dense<0.000000e+00> : vector<24x128xf32>
    %63 = tpu.matmul %60, %62, %cst_27 {dimension_numbers = #tpu.dot_dimension_numbers<[1], [0], [0], [1], [0, 0, 1, 1], [], []>} : vector<24x128xbf16>, vector<128x128xbf16>, vector<24x128xf32> -> vector<24x128xf32>
    %cst_28 = arith.constant 0.000000e+00 : f32
    %64 = vector.broadcast %cst_28 : f32 to vector<1x128xf32>
    %65 = vector.extract_strided_slice %63 {offsets = [0, 0], sizes = [23, 128], strides = [1, 1]} : vector<24x128xf32> to vector<23x128xf32>
    %66 = tpu.concatenate %64, %65 in 0 : vector<1x128xf32>, vector<23x128xf32> -> vector<24x128xf32>
    %c1_29 = arith.constant 1 : index
    %c0_30 = arith.constant 0 : index
    %c0_31 = arith.constant 0 : index
    %67 = vector.load %arg4[%c1_29, %c0_30, %c0_31] : memref<3x128x128xbf16, #tpu.memory_space<vmem>>, vector<1x128x128xbf16>
    %68 = vector.shape_cast %67 : vector<1x128x128xbf16> to vector<128x128xbf16>
    %cst_32 = arith.constant dense<0.000000e+00> : vector<24x128xf32>
    %69 = tpu.matmul %60, %68, %cst_32 {dimension_numbers = #tpu.dot_dimension_numbers<[1], [0], [0], [1], [0, 0, 1, 1], [], []>} : vector<24x128xbf16>, vector<128x128xbf16>, vector<24x128xf32> -> vector<24x128xf32>
    %70 = arith.addf %66, %69 : vector<24x128xf32>
    %c2_33 = arith.constant 2 : index
    %c0_34 = arith.constant 0 : index
    %c0_35 = arith.constant 0 : index
    %71 = vector.load %arg4[%c2_33, %c0_34, %c0_35] : memref<3x128x128xbf16, #tpu.memory_space<vmem>>, vector<1x128x128xbf16>
    %72 = vector.shape_cast %71 : vector<1x128x128xbf16> to vector<128x128xbf16>
    %cst_36 = arith.constant dense<0.000000e+00> : vector<24x128xf32>
    %73 = tpu.matmul %60, %72, %cst_36 {dimension_numbers = #tpu.dot_dimension_numbers<[1], [0], [0], [1], [0, 0, 1, 1], [], []>} : vector<24x128xbf16>, vector<128x128xbf16>, vector<24x128xf32> -> vector<24x128xf32>
    %cst_37 = arith.constant 0.000000e+00 : f32
    %74 = vector.broadcast %cst_37 : f32 to vector<1x128xf32>
    %75 = vector.extract_strided_slice %73 {offsets = [1, 0], sizes = [23, 128], strides = [1, 1]} : vector<24x128xf32> to vector<23x128xf32>
    %76 = tpu.concatenate %75, %74 in 0 : vector<23x128xf32>, vector<1x128xf32> -> vector<24x128xf32>
    %77 = arith.addf %70, %76 : vector<24x128xf32>
    %c0_38 = arith.constant 0 : index
    %c0_39 = arith.constant 0 : index
    %78 = vector.load %arg5[%c0_38, %c0_39] : memref<1x128xf32, #tpu.memory_space<vmem>>, vector<1x128xf32>
    %79 = vector.broadcast %78 : vector<1x128xf32> to vector<24x128xf32>
    %80 = arith.addf %77, %79 : vector<24x128xf32>
    %cst_40 = arith.constant 5.000000e-01 : f32
    %81 = vector.broadcast %cst_40 : f32 to vector<24x128xf32>
    %82 = arith.mulf %81, %80 : vector<24x128xf32>
    %83 = arith.mulf %80, %80 : vector<24x128xf32>
    %84 = arith.mulf %83, %80 : vector<24x128xf32>
    %cst_41 = arith.constant 4.471500e-02 : f32
    %85 = vector.broadcast %cst_41 : f32 to vector<24x128xf32>
    %86 = arith.mulf %85, %84 : vector<24x128xf32>
    %87 = arith.addf %80, %86 : vector<24x128xf32>
    %cst_42 = arith.constant 0.797884583 : f32
    %88 = vector.broadcast %cst_42 : f32 to vector<24x128xf32>
    %89 = arith.mulf %88, %87 : vector<24x128xf32>
    %90 = math.tanh %89 : vector<24x128xf32>
    %cst_43 = arith.constant 1.000000e+00 : f32
    %91 = vector.broadcast %cst_43 : f32 to vector<24x128xf32>
    %92 = arith.addf %91, %90 : vector<24x128xf32>
    %93 = arith.mulf %82, %92 : vector<24x128xf32>
    %cst_44 = arith.constant 0.000000e+00 : f32
    %94 = vector.broadcast %cst_44 : f32 to vector<24x128xf32>
    %95 = arith.select %21, %93, %94 : vector<24x128xi1>, vector<24x128xf32>
    %96 = arith.truncf %95 : vector<24x128xf32> to vector<24x128xbf16>
    %c0_45 = arith.constant 0 : index
    %c0_46 = arith.constant 0 : index
    %c0_47 = arith.constant 0 : index
    %97 = vector.load %arg6[%c0_45, %c0_46, %c0_47] : memref<3x128x128xbf16, #tpu.memory_space<vmem>>, vector<1x128x128xbf16>
    %98 = vector.shape_cast %97 : vector<1x128x128xbf16> to vector<128x128xbf16>
    %cst_48 = arith.constant dense<0.000000e+00> : vector<24x128xf32>
    %99 = tpu.matmul %96, %98, %cst_48 {dimension_numbers = #tpu.dot_dimension_numbers<[1], [0], [0], [1], [0, 0, 1, 1], [], []>} : vector<24x128xbf16>, vector<128x128xbf16>, vector<24x128xf32> -> vector<24x128xf32>
    %cst_49 = arith.constant 0.000000e+00 : f32
    %100 = vector.broadcast %cst_49 : f32 to vector<1x128xf32>
    %101 = vector.extract_strided_slice %99 {offsets = [0, 0], sizes = [23, 128], strides = [1, 1]} : vector<24x128xf32> to vector<23x128xf32>
    %102 = tpu.concatenate %100, %101 in 0 : vector<1x128xf32>, vector<23x128xf32> -> vector<24x128xf32>
    %c1_50 = arith.constant 1 : index
    %c0_51 = arith.constant 0 : index
    %c0_52 = arith.constant 0 : index
    %103 = vector.load %arg6[%c1_50, %c0_51, %c0_52] : memref<3x128x128xbf16, #tpu.memory_space<vmem>>, vector<1x128x128xbf16>
    %104 = vector.shape_cast %103 : vector<1x128x128xbf16> to vector<128x128xbf16>
    %cst_53 = arith.constant dense<0.000000e+00> : vector<24x128xf32>
    %105 = tpu.matmul %96, %104, %cst_53 {dimension_numbers = #tpu.dot_dimension_numbers<[1], [0], [0], [1], [0, 0, 1, 1], [], []>} : vector<24x128xbf16>, vector<128x128xbf16>, vector<24x128xf32> -> vector<24x128xf32>
    %106 = arith.addf %102, %105 : vector<24x128xf32>
    %c2_54 = arith.constant 2 : index
    %c0_55 = arith.constant 0 : index
    %c0_56 = arith.constant 0 : index
    %107 = vector.load %arg6[%c2_54, %c0_55, %c0_56] : memref<3x128x128xbf16, #tpu.memory_space<vmem>>, vector<1x128x128xbf16>
    %108 = vector.shape_cast %107 : vector<1x128x128xbf16> to vector<128x128xbf16>
    %cst_57 = arith.constant dense<0.000000e+00> : vector<24x128xf32>
    %109 = tpu.matmul %96, %108, %cst_57 {dimension_numbers = #tpu.dot_dimension_numbers<[1], [0], [0], [1], [0, 0, 1, 1], [], []>} : vector<24x128xbf16>, vector<128x128xbf16>, vector<24x128xf32> -> vector<24x128xf32>
    %cst_58 = arith.constant 0.000000e+00 : f32
    %110 = vector.broadcast %cst_58 : f32 to vector<1x128xf32>
    %111 = vector.extract_strided_slice %109 {offsets = [1, 0], sizes = [23, 128], strides = [1, 1]} : vector<24x128xf32> to vector<23x128xf32>
    %112 = tpu.concatenate %111, %110 in 0 : vector<23x128xf32>, vector<1x128xf32> -> vector<24x128xf32>
    %113 = arith.addf %106, %112 : vector<24x128xf32>
    %c0_59 = arith.constant 0 : index
    %c0_60 = arith.constant 0 : index
    %114 = vector.load %arg7[%c0_59, %c0_60] : memref<1x128xf32, #tpu.memory_space<vmem>>, vector<1x128xf32>
    %115 = vector.broadcast %114 : vector<1x128xf32> to vector<24x128xf32>
    %116 = arith.addf %113, %115 : vector<24x128xf32>
    %cst_61 = arith.constant 5.000000e-01 : f32
    %117 = vector.broadcast %cst_61 : f32 to vector<24x128xf32>
    %118 = arith.mulf %117, %116 : vector<24x128xf32>
    %119 = arith.mulf %116, %116 : vector<24x128xf32>
    %120 = arith.mulf %119, %116 : vector<24x128xf32>
    %cst_62 = arith.constant 4.471500e-02 : f32
    %121 = vector.broadcast %cst_62 : f32 to vector<24x128xf32>
    %122 = arith.mulf %121, %120 : vector<24x128xf32>
    %123 = arith.addf %116, %122 : vector<24x128xf32>
    %cst_63 = arith.constant 0.797884583 : f32
    %124 = vector.broadcast %cst_63 : f32 to vector<24x128xf32>
    %125 = arith.mulf %124, %123 : vector<24x128xf32>
    %126 = math.tanh %125 : vector<24x128xf32>
    %cst_64 = arith.constant 1.000000e+00 : f32
    %127 = vector.broadcast %cst_64 : f32 to vector<24x128xf32>
    %128 = arith.addf %127, %126 : vector<24x128xf32>
    %129 = arith.mulf %118, %128 : vector<24x128xf32>
    %cst_65 = arith.constant 0.000000e+00 : f32
    %130 = vector.broadcast %cst_65 : f32 to vector<24x128xf32>
    %131 = arith.select %21, %129, %130 : vector<24x128xi1>, vector<24x128xf32>
    %132 = vector.shape_cast %131 : vector<24x128xf32> to vector<1x24x128xf32>
    %c0_66 = arith.constant 0 : index
    %c0_67 = arith.constant 0 : index
    %c0_68 = arith.constant 0 : index
    %133 = vector.load %arg8[%c0_66, %c0_67, %c0_68] : memref<1x24x128xf32, #tpu.memory_space<vmem>>, vector<1x24x128xf32>
    tpu.vector_store %arg8[%c0_66, %c0_67, %c0_68], %132 {strides = array<i32>} : memref<1x24x128xf32, #tpu.memory_space<vmem>>, vector<1x24x128xf32>,
    return
  }
  func.func @transform_0(%arg0: i32) -> (i32, i32, i32) {
    %c0_i32 = arith.constant 0 : i32
    %c0_i32_0 = arith.constant 0 : i32
    %c0_i32_1 = arith.constant 0 : i32
    return %arg0, %c0_i32, %c0_i32_0 : i32, i32, i32
  }
  func.func @transform_1(%arg0: i32) -> (i32, i32, i32) {
    %c0_i32 = arith.constant 0 : i32
    %c0_i32_0 = arith.constant 0 : i32
    %c0_i32_1 = arith.constant 0 : i32
    %c0_i32_2 = arith.constant 0 : i32
    return %c0_i32, %c0_i32_0, %c0_i32_1 : i32, i32, i32
  }
  func.func @transform_2(%arg0: i32) -> (i32, i32) {
    %c0_i32 = arith.constant 0 : i32
    %c0_i32_0 = arith.constant 0 : i32
    %c0_i32_1 = arith.constant 0 : i32
    return %c0_i32, %c0_i32_0 : i32, i32
  }
  func.func @transform_3(%arg0: i32) -> (i32, i32, i32) {
    %c0_i32 = arith.constant 0 : i32
    %c0_i32_0 = arith.constant 0 : i32
    %c0_i32_1 = arith.constant 0 : i32
    %c0_i32_2 = arith.constant 0 : i32
    return %c0_i32, %c0_i32_0, %c0_i32_1 : i32, i32, i32
  }
  func.func @transform_4(%arg0: i32) -> (i32, i32) {
    %c0_i32 = arith.constant 0 : i32
    %c0_i32_0 = arith.constant 0 : i32
    %c0_i32_1 = arith.constant 0 : i32
    return %c0_i32, %c0_i32_0 : i32, i32
  }
  func.func @transform_5(%arg0: i32) -> (i32, i32, i32) {
    %c0_i32 = arith.constant 0 : i32
    %c0_i32_0 = arith.constant 0 : i32
    %c0_i32_1 = arith.constant 0 : i32
    %c0_i32_2 = arith.constant 0 : i32
    return %c0_i32, %c0_i32_0, %c0_i32_1 : i32, i32, i32
  }
  func.func @transform_6(%arg0: i32) -> (i32, i32) {
    %c0_i32 = arith.constant 0 : i32
    %c0_i32_0 = arith.constant 0 : i32
    %c0_i32_1 = arith.constant 0 : i32
    return %c0_i32, %c0_i32_0 : i32, i32
  }
  func.func @transform_7(%arg0: i32) -> (i32, i32, i32) {
    %c0_i32 = arith.constant 0 : i32
    %c0_i32_0 = arith.constant 0 : i32
    %c0_i32_1 = arith.constant 0 : i32
    return %arg0, %c0_i32, %c0_i32_0 : i32, i32, i32
  }
}

</mosaic_0001>

<bundles_post_ra>
// kernel: tile.18
= control target key start
LH: loop header
LB: loop body
LE: loop exit
PB: predicated region body
PF: predicated region fallthrough
CT: control target
= control target key end

     0   :  { %s28_s0 = inlined_call_operand.vmem [shape: f32[8], index: 0, kind: input, shape index: {}]   ;;  %s29_s1 = inlined_call_operand.vmem [shape: f32[16,8], index: 1, kind: output, shape index: {}]  }
   0x1   :  { %v4_v0 = vld [vmem:[%s28_s0] ss:$0 sm:$0xff] }
   0x2   :  { %5 = vst [vmem:[%s29_s1] sm:$0xff] %v4_v0  ;;  %8 = vst [vmem:[%s29_s1 + $0x8] sm:$0xff] %v4_v0 }

// kernel: tile.19
= control target key start
LH: loop header
LB: loop body
LE: loop exit
PB: predicated region body
PF: predicated region fallthrough
CT: control target
= control target key end

     0   :  { %s131_s10 = smov 120   ;;  %s132_s11 = smov 104   ;;  %vm3_vm0 = vcmask 64512   ;;  %vm9_vm1 = vcmask 1048512   ;;  %vm15_vm2 = vcmask 982912   ;;  %vm21_vm3 = vcmask 917312   ;;  %s207_s0 = inlined_call_operand.vmem [shape: f32[16,8], index: 0, kind: input, shape index: {}]   ;;  %s208_s1 = inlined_call_operand.vmem [shape: f32[1,128], index: 1, kind: output, shape index: {}]  }
   0x1   :  { %v101_v0 = vld [vmem:[%s207_s0 + $0xf] sm:$0x1]   ;;  %v103_v1 = vld [vmem:[%s207_s0 + $0xd] sm:$0x1]   ;;  %v102_v2 = vld [vmem:[%s207_s0 + $0xe] sm:$0x1]  }
   0x2   :  { %7 = vrot.lane.b32.xlu0 %v101_v0, %s131_s10  ;;  %19 = vrot.lane.b32.xlu1 %v103_v1, %s132_s11  ;;  %v104_v3 = vld [vmem:[%s207_s0 + $0xc] sm:$0x1]   ;;  %s133_s16 = smov 112   ;;  %s134_s17 = smov 96   ;;  %v105_v4 = vld [vmem:[%s207_s0 + $0xb] sm:$0x1]  }
   0x3   :  { %v106_v5 = vld [vmem:[%s207_s0 + $0xa] sm:$0x1]   ;;  %v2_v6 = vld [vmem:[%s207_s0] sm:$0x1]   ;;  %s135_s24 = smov 88   ;;  %s136_s25 = smov 80  }
   0x4   :  { %4 = vst.msk [vmem:[#allocation0] sm:$0x1] %vm3_vm0, %v2_v6   ;;  %v107_v7 = vld [vmem:[%s207_s0 + $0x9] sm:$0x1]   ;;  %v108_v8 = vld [vmem:[%s207_s0 + $0x8] sm:$0x1]  }
   0x5   :  { %s137_s30 = smov 72   ;;  %s138_s2 = smov 64   ;;  %v109_v9 = vld [vmem:[%s207_s0 + $0x7] sm:$0x1]   ;;  %v110_v10 = vld [vmem:[%s207_s0 + $0x6] sm:$0x1]  }
   0x6   :  { %13 = vrot.lane.b32.xlu0 %v102_v2, %s133_s16  ;;  %25 = vrot.lane.b32.xlu1 %v104_v3, %s134_s17  ;;  %s139_s7 = smov 56   ;;  %s140_s8 = smov 48   ;;  %v111_v11 = vld [vmem:[%s207_s0 + $0x5] sm:$0x1]   ;;  %v112_v12 = vld [vmem:[%s207_s0 + $0x4] sm:$0x1]  }
   0x7   :  { %s141_s13 = smov 40   ;;  %s142_s14 = smov 32   ;;  %v113_v13 = vld [vmem:[%s207_s0 + $0x3] sm:$0x1]   ;;  %v114_v14 = vld [vmem:[%s207_s0 + $0x2] sm:$0x1]  }
   0x8   :  { %s143_s19 = smov 24   ;;  %s144_s20 = smov 16   ;;  %v115_v15 = vld [vmem:[%s207_s0 + $0x1] sm:$0x1]   ;;  %vm27_vm4 = vcmask 851712   ;;  %vm33_vm5 = vcmask 786112  }
   0x9   :  { %s145_s0 = smov 8   ;;  %vm39_vm6 = vcmask 720512   ;;  %vm45_vm7 = vcmask 654912   ;;  %vm51_vm8 = vcmask 589312   ;;  %vm57_vm9 = vcmask 523712  }
   0xa   :  { %31 = vrot.lane.b32.xlu0 %v105_v4, %s135_s24  ;;  %37 = vrot.lane.b32.xlu1 %v106_v5, %s136_s25  ;;  %vm63_vm10 = vcmask 458112   ;;  %vm69_vm11 = vcmask 392512   ;;  %vm75_vm12 = vcmask 326912   ;;  %vm81_vm13 = vcmask 261312  }
   0xb   :  { %vm87_vm14 = vcmask 195712   ;;  %vm93_vm15 = vcmask 130112  }
   0xe   :  { %43 = vrot.lane.b32.xlu0 %v107_v7, %s137_s30  ;;  %49 = vrot.lane.b32.xlu1 %v108_v8, %s138_s2 }
  0x12   :  { %55 = vrot.lane.b32.xlu0 %v109_v9, %s139_s7  ;;  %61 = vrot.lane.b32.xlu1 %v110_v10, %s140_s8 }
  0x16   :  { %67 = vrot.lane.b32.xlu0 %v111_v11, %s141_s13  ;;  %73 = vrot.lane.b32.xlu1 %v112_v12, %s142_s14 }
  0x1a   :  { %79 = vrot.lane.b32.xlu0 %v113_v13, %s143_s19  ;;  %85 = vrot.lane.b32.xlu1 %v114_v14, %s144_s20 }
  0x1e   :  { %91 = vrot.lane.b32.xlu0 %v115_v15, %s145_s0 }
  0x74   :  { %v8_v16 = vpop.permute.xlu0 %7   ;;  %v20_v17 = vpop.permute.xlu1 %19  }
  0x75   :  { %10 = vst.msk [vmem:[#allocation0] sm:$0x1] %vm9_vm1, %v8_v16  }
  0x78   :  { %v14_v18 = vpop.permute.xlu0 %13   ;;  %v26_v19 = vpop.permute.xlu1 %25  }
  0x79   :  { %16 = vst.msk [vmem:[#allocation0] sm:$0x1] %vm15_vm2, %v14_v18  }
  0x7a   :  { %22 = vst.msk [vmem:[#allocation0] sm:$0x1] %vm21_vm3, %v20_v17  }
  0x7b   :  { %28 = vst.msk [vmem:[#allocation0] sm:$0x1] %vm27_vm4, %v26_v19  }
  0x7c   :  { %v32_v20 = vpop.permute.xlu0 %31   ;;  %v38_v21 = vpop.permute.xlu1 %37  }
  0x7d   :  { %34 = vst.msk [vmem:[#allocation0] sm:$0x1] %vm33_vm5, %v32_v20  }
  0x7e   :  { %40 = vst.msk [vmem:[#allocation0] sm:$0x1] %vm39_vm6, %v38_v21  }
  0x80   :  { %v44_v22 = vpop.permute.xlu0 %43   ;;  %v50_v23 = vpop.permute.xlu1 %49  }
  0x81   :  { %46 = vst.msk [vmem:[#allocation0] sm:$0x1] %vm45_vm7, %v44_v22  }
  0x82   :  { %52 = vst.msk [vmem:[#allocation0] sm:$0x1] %vm51_vm8, %v50_v23  }
  0x84   :  { %v56_v24 = vpop.permute.xlu0 %55   ;;  %v62_v25 = vpop.permute.xlu1 %61  }
  0x85   :  { %58 = vst.msk [vmem:[#allocation0] sm:$0x1] %vm57_vm9, %v56_v24  }
  0x86   :  { %64 = vst.msk [vmem:[#allocation0] sm:$0x1] %vm63_vm10, %v62_v25  }
  0x88   :  { %v68_v26 = vpop.permute.xlu0 %67   ;;  %v74_v27 = vpop.permute.xlu1 %73  }
  0x89   :  { %70 = vst.msk [vmem:[#allocation0] sm:$0x1] %vm69_vm11, %v68_v26  }
  0x8a   :  { %76 = vst.msk [vmem:[#allocation0] sm:$0x1] %vm75_vm12, %v74_v27  }
  0x8c   :  { %v80_v28 = vpop.permute.xlu0 %79   ;;  %v86_v29 = vpop.permute.xlu1 %85  }
  0x8d   :  { %82 = vst.msk [vmem:[#allocation0] sm:$0x1] %vm81_vm13, %v80_v28  }
  0x8e   :  { %88 = vst.msk [vmem:[#allocation0] sm:$0x1] %vm87_vm14, %v86_v29  }
  0x90   :  { %v92_v30 = vpop.permute.xlu0 %91  }
  0x91   :  { %94 = vst.msk [vmem:[#allocation0] sm:$0x1] %vm93_vm15, %v92_v30  }
  0x98   :  { %v98_v31 = vld [vmem:[#allocation0] sm:$0x1] }
  0x99   :  { %100 = vst [vmem:[%s208_s1] sm:$0x1] %v98_v31 }

// kernel: encoder_block.1
= control target key start
LH: loop header
LB: loop body
LE: loop exit
PB: predicated region body
PF: predicated region fallthrough
CT: control target
= control target key end

     0   :  { %s2273_s24 = smov 0   ;;  %s2617_s0 = inlined_call_operand.vmem [shape: f32[2,24,128], index: 0, kind: input, shape index: {}]   ;;  %s2618_s1 = inlined_call_operand.vmem [shape: bf16[3,128,128], index: 1, kind: input, shape index: {}]   ;;  %s2619_s2 = inlined_call_operand.vmem [shape: f32[1,128], index: 2, kind: input, shape index: {}]   ;;  %s2620_s3 = inlined_call_operand.vmem [shape: bf16[3,128,128], index: 3, kind: input, shape index: {}]   ;;  %s2621_s4 = inlined_call_operand.vmem [shape: f32[1,128], index: 4, kind: input, shape index: {}]   ;;  %s2622_s5 = inlined_call_operand.vmem [shape: bf16[3,128,128], index: 5, kind: input, shape index: {}]   ;;  %s2623_s6 = inlined_call_operand.vmem [shape: f32[1,128], index: 6, kind: input, shape index: {}]   ;;  %s2624_s7 = inlined_call_operand.vmem [shape: f32[2,24,128], index: 7, kind: output, shape index: {}]  }
   0x1 LB: > { %s1634_s25 = sadd.s32 4294967295, %s2231_s24   ;;  %p1638_p0 = scmp.ge.s32.totalorder %s2231_s24, 1  ;;  %s2231_s24 = sphi %s2273_s24, %s17_s24  }
   0x2   : > { %p237_p1 = scmp.lt.s32.totalorder %s2231_s24, 3 }
   0x4   : > { %p238_p2 = pnand %p1638_p0, %p237_p1 }
   0x5   : > { %v2135_v0 = vld [vmem:[%s2618_s1] sm:$0xff] (!%p238_p2)   ;;  %p269_p3 = scmp.lt.s32.totalorder (!%p238_p2), %s1634_s25, 1  ;;  %v2137_v2 = vld [vmem:[%s2618_s1 + $0x8] sm:$0xff] (!%p238_p2)   ;;  %v2139_v4 = vld [vmem:[%s2618_s1 + $0x10] sm:$0xff] (!%p238_p2)   ;;  %vm2626_vm0 = vcmask (!%p238_p2), 1040384   ;;  %v280_v63 = vlaneseq (!%p238_p2)  ;;  %vm2625_vm1 = vcmask (!%p238_p2), 1046528  }
   0x6   : > { %241 = sbr.rel (%p238_p2) target bundleno = 886 (0x376), region = 48  ;;  %v2136_v1 = vld [vmem:[%s2618_s1 + $0x40] sm:$0xff] (!%p238_p2)   ;;  %1940 = vmatprep.subr.bf16.mxu0 (!%p238_p2), %v2135_v0  ;;  %v2138_v3 = vld [vmem:[%s2618_s1 + $0x48] sm:$0xff] (!%p238_p2)   ;;  %v2140_v5 = vld [vmem:[%s2618_s1 + $0x50] sm:$0xff] (!%p238_p2)  }
   0x7   : > { %1941 = vmatpush3.bf16.msra.mxu0 (!%p238_p2), %v2135_v0  ;;  %1960 = vmatprep.subr.bf16.mxu1 (!%p238_p2), %v2136_v1  ;;  %v2141_v6 = vld [vmem:[%s2618_s1 + $0x18] sm:$0xff] (!%p238_p2)   ;;  %v2143_v8 = vld [vmem:[%s2618_s1 + $0x20] sm:$0xff] (!%p238_p2)   ;;  %v2145_v12 = vld [vmem:[%s2618_s1 + $0x28] sm:$0xff] (!%p238_p2)   ;;  %v281_v0 = vshrl.u32 (!%p238_p2), %v280_v63, 7 }
   0x8   : > { %1942 = vmatprep.subr.bf16.mxu0 (!%p238_p2), %v2137_v2  ;;  %1961 = vmatpush3.bf16.msra.mxu1 (!%p238_p2), %v2136_v1  ;;  %v2142_v7 = vld [vmem:[%s2618_s1 + $0x58] sm:$0xff] (!%p238_p2)   ;;  %v2144_v9 = vld [vmem:[%s2618_s1 + $0x60] sm:$0xff] (!%p238_p2)   ;;  %v2146_v14 = vld [vmem:[%s2618_s1 + $0x68] sm:$0xff] (!%p238_p2)  }
   0x9   : > { %1962 = vmatprep.subr.bf16.mxu1 (!%p238_p2), %v2138_v3  ;;  %v2147_v15 = vld [vmem:[%s2618_s1 + $0x30] sm:$0xff] (!%p238_p2)   ;;  %v2149_v17 = vld [vmem:[%s2618_s1 + $0x38] sm:$0xff] (!%p238_p2)   ;;  %v2151_v20 = vld [vmem:[%s2618_s1 + $0x80] sm:$0xff] (!%p238_p2)   ;;  %v282_v1 = vadd.s32 (!%p238_p2), 8, %v281_v0 }
   0xa   : > { %v2148_v16 = vld [vmem:[%s2618_s1 + $0x70] sm:$0xff] (!%p238_p2)   ;;  %v2150_v18 = vld [vmem:[%s2618_s1 + $0x78] sm:$0xff] (!%p238_p2)   ;;  %v2152_v22 = vld [vmem:[%s2618_s1 + $0x88] sm:$0xff] (!%p238_p2)  }
   0xb   : > { %1943 = vmatpush3.bf16.msra.mxu0 (!%p238_p2), %v2137_v2  ;;  %v2153_v23 = vld [vmem:[%s2618_s1 + $0x90] sm:$0xff] (!%p238_p2)   ;;  %v2154_v24 = vld [vmem:[%s2618_s1 + $0x98] sm:$0xff] (!%p238_p2)   ;;  %v2155_v25 = vld [vmem:[%s2618_s1 + $0xa0] sm:$0xff] (!%p238_p2)   ;;  %v283_v2 = vadd.s32 (!%p238_p2), 16, %v281_v0 }
   0xc   : > { %1944 = vmatprep.subr.bf16.mxu0 (!%p238_p2), %v2139_v4  ;;  %1963 = vmatpush3.bf16.msra.mxu1 (!%p238_p2), %v2138_v3  ;;  %v2156_v26 = vld [vmem:[%s2618_s1 + $0xa8] sm:$0xff] (!%p238_p2)   ;;  %v2157_v27 = vld [vmem:[%s2618_s1 + $0xb0] sm:$0xff] (!%p238_p2)   ;;  %v2158_v28 = vld [vmem:[%s2618_s1 + $0xb8] sm:$0xff] (!%p238_p2)  }
   0xd   : > { %s2650_s25 = smov (!%p269_p3, %s1634_s25), 1  ;;  %1964 = vmatprep.subr.bf16.mxu1 %v2140_v5  ;;  %v2159_v29 = vld [vmem:[%s2620_s3] sm:$0xff]   ;;  %v2161_v31 = vld [vmem:[%s2620_s3 + $0x8] sm:$0xff]   ;;  %v2163_v33 = vld [vmem:[%s2620_s3 + $0x10] sm:$0xff]  }
   0xe   : > { %s2120_s17 = smul.u32 24, %s2650_s25  ;;  %v2160_v30 = vld [vmem:[%s2620_s3 + $0x40] sm:$0xff]   ;;  %v2162_v32 = vld [vmem:[%s2620_s3 + $0x48] sm:$0xff]   ;;  %v2164_v34 = vld [vmem:[%s2620_s3 + $0x50] sm:$0xff]  }
   0xf   : > { %1945 = vmatpush3.bf16.msra.mxu0 %v2139_v4  ;;  %v2165_v35 = vld [vmem:[%s2620_s3 + $0x18] sm:$0xff]   ;;  %v2167_v37 = vld [vmem:[%s2620_s3 + $0x20] sm:$0xff]   ;;  %v2169_v39 = vld [vmem:[%s2620_s3 + $0x28] sm:$0xff]  }
  0x10   : > { %1946 = vmatprep.subr.bf16.mxu0 %v2141_v6  ;;  %1965 = vmatpush3.bf16.msra.mxu1 %v2140_v5  ;;  %s273_s26 = scalar_lea.vmem %s2617_s0, %s2120_s17  ;;  %v2166_v36 = vld [vmem:[%s2620_s3 + $0x58] sm:$0xff]   ;;  %v2168_v38 = vld [vmem:[%s2620_s3 + $0x60] sm:$0xff]   ;;  %v2170_v40 = vld [vmem:[%s2620_s3 + $0x68] sm:$0xff]   ;;  %v2418_v4 = vmul.u32.u64.low 2863311531, %v281_v0  ;;  %v2419_v5 = vmul.u32.u64.high 2863311531, %v281_v0, %v2418_v4  ;;  %s278_s19 = scalar_lea.vmem %s2624_s7, %s2120_s17 }
  0x11   : > { %1966 = vmatprep.subr.bf16.mxu1 %v2142_v7  ;;  %v341_v10 = vld [vmem:[%s273_s26] sm:$0xff]  ;;  %v342_v11 = vld [vmem:[%s273_s26 + $0x8] sm:$0xff]  ;;  %v343_v19 = vld [vmem:[%s273_s26 + $0x10] sm:$0xff] }
  0x12   : > { %v344_v13 = vpack.c.bf16 %v342_v11, %v341_v10  ;;  %v345_v21 = vpack.c.bf16 %v343_v19, %v343_v19  ;;  %v2171_v41 = vld [vmem:[%s2620_s3 + $0x30] sm:$0xff]   ;;  %v2173_v43 = vld [vmem:[%s2620_s3 + $0x38] sm:$0xff]   ;;  %v2412_v45 = vld [vmem:[%s2620_s3 + $0x80] sm:$0xff]  }
  0x13   : > { %1947 = vmatpush3.bf16.msra.mxu0 %v2141_v6  ;;  %v2172_v42 = vld [vmem:[%s2620_s3 + $0x70] sm:$0xff]   ;;  %v2174_v44 = vld [vmem:[%s2620_s3 + $0x78] sm:$0xff]  }
  0x14   : > { %1948 = vmatprep.subr.bf16.mxu0 %v2143_v8  ;;  %1967 = vmatpush3.bf16.msra.mxu1 %v2142_v7 }
  0x15   : > { %1968 = vmatprep.subr.bf16.mxu1 %v2144_v9  ;;  %1956 = vmatprep.mubr.bf16.mxu0 %v344_v13 }
  0x16   : > { %1976 = vmatprep.mubr.bf16.mxu1 %v344_v13 }
  0x17   : > { %1949 = vmatpush3.bf16.msra.mxu0 %v2143_v8 }
  0x18   : > { %1950 = vmatprep.subr.bf16.mxu0 %v2145_v12  ;;  %1969 = vmatpush3.bf16.msra.mxu1 %v2144_v9  ;;  %v2421_v8 = vmul.u32.u64.low 2863311531, %v282_v1  ;;  %v2422_v9 = vmul.u32.u64.high 2863311531, %v282_v1, %v2421_v8 }
  0x19   : > { %1970 = vmatprep.subr.bf16.mxu1 %v2146_v14  ;;  %v2204_v8 = vld [vmem:[%s2622_s5 + $0xa8] sm:$0xff]  }
  0x1b   : > { %1951 = vmatpush3.bf16.msra.mxu0 %v2145_v12  ;;  %v2424_v11 = vmul.u32.u64.low 2863311531, %v283_v2  ;;  %v2425_v12 = vmul.u32.u64.high 2863311531, %v283_v2, %v2424_v11 }
  0x1c   : > { %1952 = vmatprep.subr.bf16.mxu0 %v2147_v15  ;;  %1971 = vmatpush3.bf16.msra.mxu1 %v2146_v14  ;;  %v1697_v14 = vld [vmem:[%s2619_s2] ss:$0 sm:$0xff] }
  0x1d   : > { %1972 = vmatprep.subr.bf16.mxu1 %v2148_v16 }
  0x1f   : > { %1953 = vmatpush3.bf16.msra.mxu0 %v2147_v15 }
  0x20   : > { %1954 = vmatprep.subr.bf16.mxu0 %v2149_v17  ;;  %1973 = vmatpush3.bf16.msra.mxu1 %v2148_v16 }
  0x21   : > { %1974 = vmatprep.subr.bf16.mxu1 %v2150_v18 }
  0x23   : > { %1955 = vmatpush3.bf16.msra.mxu0 %v2149_v17 }
  0x24   : > { %1975 = vmatpush3.bf16.msra.mxu1 %v2150_v18  ;;  %1980 = vmatprep.subr.bf16.mxu0 %v2151_v20 }
  0x25   : > { %2000 = vmatprep.subr.bf16.mxu1 %v2159_v29 }
  0x26   : > { %1957 = vmatmul.mubr.bf16.vlgmr.msra.gmra.mrb[0].mxu0 %v345_v21 }
  0x27   : > { %1981 = vmatpush3.bf16.msra.mxu0 %v2151_v20  ;;  %1977 = vmatmul.mubr.bf16.vlgmr.msra.gmra.mrb[0].mxu1 %v345_v21 }
  0x28   : > { %1982 = vmatprep.subr.bf16.mxu0 %v2152_v22  ;;  %1996 = vmatprep.mubr.bf16.mxu0 %v344_v13 }
  0x29   : > { %2001 = vmatpush3.bf16.msra.mxu1 %v2159_v29 }
  0x2a   : > { %2002 = vmatprep.subr.bf16.mxu1 %v2161_v31 }
  0x2b   : > { %1983 = vmatpush3.bf16.msra.mxu0 %v2152_v22 }
  0x2c   : > { %1984 = vmatprep.subr.bf16.mxu0 %v2153_v23 }
  0x2d   : > { %2003 = vmatpush3.bf16.msra.mxu1 %v2161_v31 }
  0x2e   : > { %2004 = vmatprep.subr.bf16.mxu1 %v2163_v33 }
  0x2f   : > { %1985 = vmatpush3.bf16.msra.mxu0 %v2153_v23 }
  0x30   : > { %1986 = vmatprep.subr.bf16.mxu0 %v2154_v24 }
  0x31   : > { %2005 = vmatpush3.bf16.msra.mxu1 %v2163_v33 }
  0x32   : > { %2006 = vmatprep.subr.bf16.mxu1 %v2165_v35 }
  0x33   : > { %1987 = vmatpush3.bf16.msra.mxu0 %v2154_v24 }
  0x34   : > { %1988 = vmatprep.subr.bf16.mxu0 %v2155_v25 }
  0x35   : > { %2007 = vmatpush3.bf16.msra.mxu1 %v2165_v35 }
  0x36   : > { %2008 = vmatprep.subr.bf16.mxu1 %v2167_v37 }
  0x37   : > { %1989 = vmatpush3.bf16.msra.mxu0 %v2155_v25  ;;  %v290_v25 = vshrl.u32 %v2419_v5, 4 }
  0x38   : > { %1990 = vmatprep.subr.bf16.mxu0 %v2156_v26 }
  0x39   : > { %2009 = vmatpush3.bf16.msra.mxu1 %v2167_v37 }
  0x3a   : > { %2010 = vmatprep.subr.bf16.mxu1 %v2169_v39 }
  0x3b   : > { %1991 = vmatpush3.bf16.msra.mxu0 %v2156_v26 }
  0x3c   : > { %1992 = vmatprep.subr.bf16.mxu0 %v2157_v27 }
  0x3d   : > { %2011 = vmatpush3.bf16.msra.mxu1 %v2169_v39 }
  0x3e   : > { %2012 = vmatprep.subr.bf16.mxu1 %v2171_v41 }
  0x3f   : > { %1993 = vmatpush3.bf16.msra.mxu0 %v2157_v27 }
  0x40   : > { %1994 = vmatprep.subr.bf16.mxu0 %v2158_v28 }
  0x41   : > { %2013 = vmatpush3.bf16.msra.mxu1 %v2171_v41 }
  0x42   : > { %2014 = vmatprep.subr.bf16.mxu1 %v2173_v43 }
  0x43   : > { %1995 = vmatpush3.bf16.msra.mxu0 %v2158_v28  ;;  %v301_v28 = vshrl.u32 %v2422_v9, 4 }
  0x44   : > { %2020 = vmatprep.subr.bf16.mxu0 %v2160_v30 }
  0x45   : > { %2015 = vmatpush3.bf16.msra.mxu1 %v2173_v43  ;;  %v302_v37 = vmul.u32 24, %v301_v28  ;;  %v2193_v28 = vld [vmem:[%s2622_s5 + $0x28] sm:$0xff]  }
  0x46   : > { %1997 = vmatmul.mubr.bf16.vlgmr.msra.gmra.mrb[4].mxu0 %v345_v21  ;;  %2040 = vmatprep.subr.bf16.mxu1 %v2412_v45 }
  0x47   : > { %2021 = vmatpush3.bf16.msra.mxu0 %v2160_v30  ;;  %v312_v30 = vshrl.u32 %v2425_v12, 4  ;;  %v2176_v12 = vld [vmem:[%s2620_s3 + $0x88] sm:$0xff]  }
  0x48   : > { %2022 = vmatprep.subr.bf16.mxu0 %v2162_v32 }
  0x49   : > { %v313_v39 = vmul.u32 24, %v312_v30  ;;  %v2195_v30 = vld [vmem:[%s2622_s5 + $0x30] sm:$0xff]  }
  0x4b   : > { %2023 = vmatpush3.bf16.msra.mxu0 %v2162_v32 }
  0x4c   : > { %2024 = vmatprep.subr.bf16.mxu0 %v2164_v34 }
  0x4f   : > { %2025 = vmatpush3.bf16.msra.mxu0 %v2164_v34  ;;  %v291_v34 = vmul.u32 24, %v290_v25  ;;  %v2190_v25 = vld [vmem:[%s2622_s5 + $0x58] sm:$0xff]  }
  0x50   : > { %2026 = vmatprep.subr.bf16.mxu0 %v2166_v36 }
  0x51   : > { %v292_v43 = vsub.s32 %v281_v0, %v291_v34  ;;  %v2548_v34 = vld [vmem:[%s2622_s5 + $0x80] sm:$0xff]  }
  0x53   : > { %2027 = vmatpush3.bf16.msra.mxu0 %v2166_v36  ;;  %vm317_vm2 = vcmp.ne.s32.totalorder %v292_v43, 0  ;;  %vm320_vm3 = vcmp.lt.s32.totalorder %v292_v43, 0 }
  0x54   : > { %2028 = vmatprep.subr.bf16.mxu0 %v2168_v38  ;;  %vm323_vm8 = vmand %vm320_vm3, %vm317_vm2 }
  0x57   : > { %2029 = vmatpush3.bf16.msra.mxu0 %v2168_v38 }
  0x58   : > { %2030 = vmatprep.subr.bf16.mxu0 %v2170_v40 }
  0x5b   : > { %2031 = vmatpush3.bf16.msra.mxu0 %v2170_v40 }
  0x5c   : > { %2032 = vmatprep.subr.bf16.mxu0 %v2172_v42 }
  0x5f   : > { %2033 = vmatpush3.bf16.msra.mxu0 %v2172_v42 }
  0x60   : > { %2034 = vmatprep.subr.bf16.mxu0 %v2174_v44 }
  0x63   : > { %2035 = vmatpush3.bf16.msra.mxu0 %v2174_v44  ;;  %v303_v44 = vsub.s32 %v282_v1, %v302_v37 }
  0x65   : > { %vm318_vm4 = vcmp.ne.s32.totalorder %v303_v44, 0  ;;  %vm321_vm5 = vcmp.lt.s32.totalorder %v303_v44, 0 }
  0x66   : > { %vm324_vm9 = vmand %vm321_vm5, %vm318_vm4 }
  0xf9   : > { %v1958_v46 = vpop.f32.mrb[0].mxu0 }
  0xfa   : > { %v444_v47 = vpop.f32.mrb[1].mxu0  ;;  %v1978_v48 = vpop.f32.mrb[0].mxu1  ;;  %v465_v54 = vrot.slane %v1958_v46, 7 }
  0xfb   : > { %v462_v49 = vrot.slane %v444_v47, 7  ;;  %v1959_v50 = vpop.f32.mrb[2].mxu0  ;;  %v570_v51 = vpop.f32.mrb[1].mxu1 }
  0xfc   : > { %v447_v52 = vpop.f32.mrb[3].mxu0  ;;  %v1979_v53 = vpop.f32.mrb[2].mxu1 }
  0xfd   : > { %v463_v55 = vrot.slane %v447_v52, 7  ;;  %v470_v56 = vsel %vm2626_vm0, 0.0, %v462_v49  ;;  %v573_v57 = vpop.f32.mrb[3].mxu1  ;;  %v327_v52 = vadd.s32 24, %v303_v44 }
  0xfe   : > { %v584_v58 = vadd.f32 %v570_v51, %v470_v56  ;;  %v326_v51 = vadd.s32 24, %v292_v43 }
  0xff   : > { %v466_v59 = vsel %vm2626_vm0, %v463_v55, %v465_v54  ;;  %v464_v60 = vsel %vm2626_vm0, %v462_v49, %v463_v55  ;;  %v330_v55 = vsel %vm324_vm9, %v327_v52, %v303_v44 }
 0x100   : > { %v586_v61 = vadd.f32 %v1978_v48, %v466_v59  ;;  %v585_v62 = vadd.f32 %v573_v57, %v464_v60  ;;  %v314_v48 = vsub.s32 %v283_v2, %v313_v39  ;;  %v329_v54 = vsel %vm323_vm8, %v326_v51, %v292_v43 }
 0x101   : > { %vm332_vm11 = vcmp.ge.s32.totalorder %v329_v54, 1  ;;  %vm335_vm12 = vcmp.lt.s32.totalorder %v329_v54, 17  ;;  %vm333_vm13 = vcmp.ge.s32.totalorder %v330_v55, 1  ;;  %vm336_vm14 = vcmp.lt.s32.totalorder %v330_v55, 17 }
 0x102   : > { %vm319_vm6 = vcmp.ne.s32.totalorder %v314_v48, 0  ;;  %vm322_vm7 = vcmp.lt.s32.totalorder %v314_v48, 0  ;;  %v328_v53 = vadd.s32 24, %v314_v48  ;;  %vm2436_vm0 = vmand %vm332_vm11, %vm335_vm12  ;;  %vm2640_vm8 = vcmask 1046528  }
 0x103   : > { %vm325_vm10 = vmand %vm322_vm7, %vm319_vm6 }
 0x104   : > { %v331_v57 = vsel %vm325_vm10, %v328_v53, %v314_v48  ;;  %vm2440_vm2 = vmand %vm333_vm13, %vm336_vm14 }
 0x105   : > { %vm334_vm15 = vcmp.ge.s32.totalorder %v331_v57, 1  ;;  %vm2452_vm4 = vmpackc.low %vm2440_vm2, %vm2436_vm0 }
 0x106   : > { %vm2641_vm9 = vmmov %vm2640_vm8 }
 0x107   : > { %vm2642_vm10 = vmmov %vm2640_vm8 }
 0x108   : > { %vm2646_vm14 = vmmov %vm2640_vm8 }
 0x119   : > { %v1998_v3 = vpop.f32.mrb[4].mxu0 }
 0x11a   : > { %v707_v6 = vrot.slane %v1998_v3, 1  ;;  %v686_v7 = vpop.f32.mrb[5].mxu0 }
 0x11b   : > { %v1999_v10 = vpop.f32.mrb[6].mxu0  ;;  %v704_v17 = vrot.slane %v686_v7, 1 }
 0x11c   : > { %v712_v13 = vsel %vm2625_vm1, %v707_v6, 0.0  ;;  %v689_v15 = vpop.f32.mrb[7].mxu0 }
 0x11d   : > { %v715_v16 = vadd.f32 %v712_v13, %v586_v61  ;;  %v705_v18 = vrot.slane %v689_v15, 1  ;;  %v2177_v13 = vld [vmem:[%s2620_s3 + $0x90] sm:$0xff]   ;;  %v2180_v15 = vld [vmem:[%s2620_s3 + $0xa8] sm:$0xff]  }
 0x11f   : > { %v725_v19 = vadd.f32 %v1697_v14, %v715_v16  ;;  %v706_v20 = vsel %vm2625_vm1, %v704_v17, %v705_v18  ;;  %v708_v21 = vsel %vm2625_vm1, %v705_v18, %v707_v6  ;;  %vm337_vm1 = vcmp.lt.s32.totalorder %v331_v57, 17  ;;  %v2181_v16 = vld [vmem:[%s2620_s3 + $0xb0] sm:$0xff]   ;;  %v2182_v17 = vld [vmem:[%s2620_s3 + $0xb8] sm:$0xff]   ;;  %v2183_v18 = vld [vmem:[%s2622_s5] sm:$0xff]  }
 0x120   : > { %v713_v22 = vadd.f32 %v706_v20, %v584_v58  ;;  %v714_v23 = vadd.f32 %v708_v21, %v585_v62  ;;  %vm2444_vm3 = vmand %vm334_vm15, %vm337_vm1  ;;  %2060 = vmatprep.subr.bf16.mxu0 %v2183_v18  ;;  %v2185_v20 = vld [vmem:[%s2622_s5 + $0x8] sm:$0xff]   ;;  %vm2637_vm1 = vcmask 1040384  }
 0x121   : > { %v731_v24 = vmul.f32 %v725_v19, %v725_v19  ;;  %v728_v61 = vmul.f32 0.5, %v725_v19  ;;  %vm2459_vm5 = vmpackc.low %vm2444_vm3, %vm2444_vm3  ;;  %v2186_v21 = vld [vmem:[%s2622_s5 + $0x48] sm:$0xff]  }
 0x122   : > { %v723_v26 = vadd.f32 %v1697_v14, %v713_v22  ;;  %v724_v27 = vadd.f32 %v1697_v14, %v714_v23  ;;  %v2178_v14 = vld [vmem:[%s2620_s3 + $0x98] sm:$0xff]   ;;  %v2187_v22 = vld [vmem:[%s2622_s5 + $0x10] sm:$0xff]   ;;  %vm2638_vm6 = vmmov %vm2637_vm1 }
 0x123   : > { %v734_v29 = vmul.f32 %v731_v24, %v725_v19  ;;  %v2188_v23 = vld [vmem:[%s2622_s5 + $0x50] sm:$0xff]   ;;  %v2189_v24 = vld [vmem:[%s2622_s5 + $0x18] sm:$0xff]   ;;  %vm2639_vm7 = vmmov %vm2637_vm1 }
 0x124   : > { %v729_v31 = vmul.f32 %v723_v26, %v723_v26  ;;  %v730_v32 = vmul.f32 %v724_v27, %v724_v27  ;;  %v726_v63 = vmul.f32 0.5, %v723_v26  ;;  %v727_v2 = vmul.f32 0.5, %v724_v27  ;;  %vm2643_vm11 = vmmov %vm2637_vm1 }
 0x125   : > { %v737_v33 = vmul.f32 0.044715, %v734_v29  ;;  %v2194_v29 = vld [vmem:[%s2622_s5 + $0x68] sm:$0xff]   ;;  %vm2644_vm12 = vmmov %vm2637_vm1 }
 0x126   : > { %v732_v35 = vmul.f32 %v729_v31, %v723_v26  ;;  %v733_v36 = vmul.f32 %v730_v32, %v724_v27  ;;  %v2196_v31 = vld [vmem:[%s2622_s5 + $0x70] sm:$0xff]   ;;  %v2197_v32 = vld [vmem:[%s2622_s5 + $0x38] sm:$0xff]   ;;  %vm2645_vm13 = vmmov %vm2637_vm1 }
 0x127   : > { %v740_v38 = vadd.f32 %v737_v33, %v725_v19  ;;  %v2184_v19 = vld [vmem:[%s2622_s5 + $0x40] sm:$0xff]   ;;  %v2198_v33 = vld [vmem:[%s2622_s5 + $0x78] sm:$0xff]   ;;  %vm2647_vm15 = vmmov %vm2640_vm8 }
 0x128   : > { %v735_v40 = vmul.f32 0.044715, %v732_v35  ;;  %v736_v41 = vmul.f32 0.044715, %v733_v36 }
 0x129   : > { %v743_v42 = vmul.f32 0.7978846, %v740_v38 }
 0x12a   : > { %v738_v46 = vadd.f32 %v735_v40, %v723_v26  ;;  %v739_v47 = vadd.f32 %v736_v41, %v724_v27  ;;  %v2191_v26 = vld [vmem:[%s2622_s5 + $0x20] sm:$0xff]  }
 0x12b   : > { %2207 = vtanh.f32 %v743_v42  ;;  %v2192_v27 = vld [vmem:[%s2622_s5 + $0x60] sm:$0xff]  }
 0x12c   : > { %v741_v49 = vmul.f32 0.7978846, %v738_v46  ;;  %v742_v50 = vmul.f32 0.7978846, %v739_v47 }
 0x12e   : > { %2209 = vtanh.f32 %v741_v49 }
 0x12f   : > { %2211 = vtanh.f32 %v742_v50 }
 0x135   : > { %v2208_v56 = vpop.eup %2207 }
 0x136   : > { %v749_v58 = vadd.f32 1.0, %v2208_v56 }
 0x138   : > { %v2210_v59 = vpop.eup %2209  ;;  %v752_v6 = vmul.f32 %v749_v58, %v728_v61  ;;  %v1772_v58 = vld [vmem:[%s2621_s4] ss:$0 sm:$0xff] }
 0x139   : > { %v2212_v60 = vpop.eup %2211  ;;  %v747_v0 = vadd.f32 1.0, %v2210_v59 }
 0x13a   : > { %v748_v3 = vadd.f32 1.0, %v2212_v60  ;;  %v1710_v11 = vpack.c.bf16 %v752_v6, %v752_v6 }
 0x13b   : > { %v750_v4 = vmul.f32 %v747_v0, %v726_v63 }
 0x13c   : > { %v751_v7 = vmul.f32 %v748_v3, %v727_v2 }
 0x13e   : > { %v1707_v9 = vpack.c.bf16 %v751_v7, %v750_v4 }
 0x140   : > { %2016 = vmatprep.mubr.msk.bf16.mxu1 %vm2452_vm4, %v1707_v9  ;;  %2036 = vmatprep.mubr.msk.bf16.mxu0 %vm2452_vm4, %v1707_v9 }
 0x141   : > { %2017 = vmatmul.mubr.msk.bf16.vlgmr.msra.gmra.mrb[4].mxu1 %vm2459_vm5, %v1710_v11  ;;  %2037 = vmatmul.mubr.msk.bf16.vlgmr.msra.gmra.mrb[8].mxu0 %vm2459_vm5, %v1710_v11 }
 0x142   : > { %2041 = vmatpush3.bf16.msra.mxu1 %v2412_v45  ;;  %2056 = vmatprep.mubr.msk.bf16.mxu1 %vm2452_vm4, %v1707_v9  ;;  %v2179_v45 = vld [vmem:[%s2620_s3 + $0xa0] sm:$0xff]  }
 0x143   : > { %2042 = vmatprep.subr.bf16.mxu1 %v2176_v12  ;;  %2061 = vmatpush3.bf16.msra.mxu0 %v2183_v18 }
 0x144   : > { %2062 = vmatprep.subr.bf16.mxu0 %v2185_v20 }
 0x146   : > { %2043 = vmatpush3.bf16.msra.mxu1 %v2176_v12 }
 0x147   : > { %2044 = vmatprep.subr.bf16.mxu1 %v2177_v13  ;;  %2063 = vmatpush3.bf16.msra.mxu0 %v2185_v20 }
 0x148   : > { %2064 = vmatprep.subr.bf16.mxu0 %v2187_v22 }
 0x14a   : > { %2045 = vmatpush3.bf16.msra.mxu1 %v2177_v13 }
 0x14b   : > { %2046 = vmatprep.subr.bf16.mxu1 %v2178_v14  ;;  %2065 = vmatpush3.bf16.msra.mxu0 %v2187_v22 }
 0x14c   : > { %2066 = vmatprep.subr.bf16.mxu0 %v2189_v24 }
 0x14e   : > { %2047 = vmatpush3.bf16.msra.mxu1 %v2178_v14 }
 0x14f   : > { %2048 = vmatprep.subr.bf16.mxu1 %v2179_v45  ;;  %2067 = vmatpush3.bf16.msra.mxu0 %v2189_v24 }
 0x150   : > { %2068 = vmatprep.subr.bf16.mxu0 %v2191_v26 }
 0x152   : > { %2049 = vmatpush3.bf16.msra.mxu1 %v2179_v45 }
 0x153   : > { %2050 = vmatprep.subr.bf16.mxu1 %v2180_v15  ;;  %2069 = vmatpush3.bf16.msra.mxu0 %v2191_v26 }
 0x154   : > { %2070 = vmatprep.subr.bf16.mxu0 %v2193_v28 }
 0x156   : > { %2051 = vmatpush3.bf16.msra.mxu1 %v2180_v15 }
 0x157   : > { %2052 = vmatprep.subr.bf16.mxu1 %v2181_v16  ;;  %2071 = vmatpush3.bf16.msra.mxu0 %v2193_v28 }
 0x158   : > { %2072 = vmatprep.subr.bf16.mxu0 %v2195_v30 }
 0x15a   : > { %2053 = vmatpush3.bf16.msra.mxu1 %v2181_v16 }
 0x15b   : > { %2054 = vmatprep.subr.bf16.mxu1 %v2182_v17  ;;  %2073 = vmatpush3.bf16.msra.mxu0 %v2195_v30 }
 0x15c   : > { %2074 = vmatprep.subr.bf16.mxu0 %v2197_v32 }
 0x15e   : > { %2055 = vmatpush3.bf16.msra.mxu1 %v2182_v17 }
 0x15f   : > { %2080 = vmatprep.subr.bf16.mxu1 %v2184_v19  ;;  %2075 = vmatpush3.bf16.msra.mxu0 %v2197_v32 }
 0x160   : > { %2100 = vmatprep.subr.bf16.mxu0 %v2548_v34 }
 0x161   : > { %2057 = vmatmul.mubr.msk.bf16.vlgmr.msra.gmra.mrb[8].mxu1 %vm2459_vm5, %v1710_v11 }
 0x162   : > { %2081 = vmatpush3.bf16.msra.mxu1 %v2184_v19 }
 0x163   : > { %2082 = vmatprep.subr.bf16.mxu1 %v2186_v21 }
 0x166   : > { %2083 = vmatpush3.bf16.msra.mxu1 %v2186_v21 }
 0x167   : > { %2084 = vmatprep.subr.bf16.mxu1 %v2188_v23 }
 0x16a   : > { %2085 = vmatpush3.bf16.msra.mxu1 %v2188_v23 }
 0x16b   : > { %2086 = vmatprep.subr.bf16.mxu1 %v2190_v25 }
 0x16e   : > { %2087 = vmatpush3.bf16.msra.mxu1 %v2190_v25 }
 0x16f   : > { %2088 = vmatprep.subr.bf16.mxu1 %v2192_v27 }
 0x172   : > { %2089 = vmatpush3.bf16.msra.mxu1 %v2192_v27 }
 0x173   : > { %2090 = vmatprep.subr.bf16.mxu1 %v2194_v29 }
 0x176   : > { %2091 = vmatpush3.bf16.msra.mxu1 %v2194_v29 }
 0x177   : > { %2092 = vmatprep.subr.bf16.mxu1 %v2196_v31 }
 0x17a   : > { %2093 = vmatpush3.bf16.msra.mxu1 %v2196_v31 }
 0x17b   : > { %2094 = vmatprep.subr.bf16.mxu1 %v2198_v33 }
 0x17e   : > { %2095 = vmatpush3.bf16.msra.mxu1 %v2198_v33 }
 0x214   : > { %v2018_v35 = vpop.f32.mrb[4].mxu1  ;;  %v2038_v36 = vpop.f32.mrb[8].mxu0 }
 0x215   : > { %v856_v37 = vpop.f32.mrb[5].mxu1  ;;  %v981_v38 = vpop.f32.mrb[9].mxu0  ;;  %v876_v44 = vrot.slane %v2018_v35, 7 }
 0x216   : > { %v873_v39 = vrot.slane %v856_v37, 7  ;;  %v2019_v40 = vpop.f32.mrb[6].mxu1  ;;  %v2039_v41 = vpop.f32.mrb[10].mxu0 }
 0x217   : > { %v859_v42 = vpop.f32.mrb[7].mxu1  ;;  %v984_v43 = vpop.f32.mrb[11].mxu0  ;;  %v2200_v40 = vld [vmem:[%s2622_s5 + $0x88] sm:$0xff]   ;;  %v2201_v41 = vld [vmem:[%s2622_s5 + $0x90] sm:$0xff]  }
 0x218   : > { %v881_v46 = vsel %vm2637_vm1, 0.0, %v873_v39  ;;  %v874_v47 = vrot.slane %v859_v42, 7  ;;  %v2202_v42 = vld [vmem:[%s2622_s5 + $0x98] sm:$0xff]  }
 0x219   : > { %v995_v48 = vadd.f32 %v981_v38, %v881_v46 }
 0x21a   : > { %v877_v49 = vsel %vm2638_vm6, %v874_v47, %v876_v44  ;;  %v875_v50 = vsel %vm2639_vm7, %v873_v39, %v874_v47  ;;  %v2206_v44 = vld [vmem:[%s2622_s5 + $0xb8] sm:$0xff]  }
 0x21b   : > { %v996_v51 = vadd.f32 %v984_v43, %v875_v50  ;;  %v997_v52 = vadd.f32 %v2038_v36, %v877_v49  ;;  %v2205_v43 = vld [vmem:[%s2622_s5 + $0xb0] sm:$0xff]  }
 0x234   : > { %v2058_v53 = vpop.f32.mrb[8].mxu1 }
 0x235   : > { %v1117_v54 = vrot.slane %v2058_v53, 1  ;;  %v1097_v55 = vpop.f32.mrb[9].mxu1 }
 0x236   : > { %v2059_v56 = vpop.f32.mrb[10].mxu1  ;;  %v1114_v61 = vrot.slane %v1097_v55, 1 }
 0x237   : > { %v1122_v57 = vsel %vm2640_vm8, %v1117_v54, 0.0  ;;  %v1100_v59 = vpop.f32.mrb[11].mxu1 }
 0x238   : > { %v1125_v60 = vadd.f32 %v1122_v57, %v997_v52  ;;  %v1115_v63 = vrot.slane %v1100_v59, 1 }
 0x23a   : > { %v1135_v0 = vadd.f32 %v1772_v58, %v1125_v60  ;;  %v1116_v2 = vsel %vm2641_vm9, %v1114_v61, %v1115_v63  ;;  %v1118_v3 = vsel %vm2642_vm10, %v1115_v63, %v1117_v54 }
 0x23b   : > { %v1123_v4 = vadd.f32 %v1116_v2, %v995_v48  ;;  %v1124_v6 = vadd.f32 %v1118_v3, %v996_v51 }
 0x23c   : > { %v1141_v7 = vmul.f32 %v1135_v0, %v1135_v0  ;;  %v1138_v29 = vmul.f32 0.5, %v1135_v0 }
 0x23d   : > { %v1133_v9 = vadd.f32 %v1772_v58, %v1123_v4  ;;  %v1134_v11 = vadd.f32 %v1772_v58, %v1124_v6  ;;  %v1847_v6 = vld [vmem:[%s2623_s6] ss:$0 sm:$0xff] }
 0x23e   : > { %v1144_v12 = vmul.f32 %v1141_v7, %v1135_v0 }
 0x23f   : > { %v1139_v13 = vmul.f32 %v1133_v9, %v1133_v9  ;;  %v1140_v14 = vmul.f32 %v1134_v11, %v1134_v11  ;;  %v1136_v30 = vmul.f32 0.5, %v1133_v9  ;;  %v1137_v32 = vmul.f32 0.5, %v1134_v11 }
 0x240   : > { %v1147_v45 = vmul.f32 0.044715, %v1144_v12 }
 0x241   : > { %v1142_v15 = vmul.f32 %v1139_v13, %v1133_v9  ;;  %v1143_v16 = vmul.f32 %v1140_v14, %v1134_v11 }
 0x242   : > { %v1150_v17 = vadd.f32 %v1147_v45, %v1135_v0 }
 0x243   : > { %v1145_v18 = vmul.f32 0.044715, %v1142_v15  ;;  %v1146_v19 = vmul.f32 0.044715, %v1143_v16 }
 0x244   : > { %v1153_v20 = vmul.f32 0.7978846, %v1150_v17 }
 0x245   : > { %v1148_v21 = vadd.f32 %v1145_v18, %v1133_v9  ;;  %v1149_v22 = vadd.f32 %v1146_v19, %v1134_v11 }
 0x246   : > { %2213 = vtanh.f32 %v1153_v20 }
 0x247   : > { %v1151_v23 = vmul.f32 0.7978846, %v1148_v21  ;;  %v1152_v24 = vmul.f32 0.7978846, %v1149_v22 }
 0x249   : > { %2215 = vtanh.f32 %v1151_v23 }
 0x24a   : > { %2217 = vtanh.f32 %v1152_v24 }
 0x250   : > { %v2214_v25 = vpop.eup %2213 }
 0x251   : > { %v1159_v26 = vadd.f32 1.0, %v2214_v25 }
 0x253   : > { %v2216_v27 = vpop.eup %2215  ;;  %v1162_v36 = vmul.f32 %v1159_v26, %v1138_v29 }
 0x254   : > { %v2218_v28 = vpop.eup %2217  ;;  %v1157_v31 = vadd.f32 1.0, %v2216_v27 }
 0x255   : > { %v1158_v33 = vadd.f32 1.0, %v2218_v28  ;;  %v1785_v39 = vpack.c.bf16 %v1162_v36, %v1162_v36 }
 0x256   : > { %v1160_v35 = vmul.f32 %v1157_v31, %v1136_v30 }
 0x257   : > { %v1161_v37 = vmul.f32 %v1158_v33, %v1137_v32 }
 0x259   : > { %v1782_v38 = vpack.c.bf16 %v1161_v37, %v1160_v35 }
 0x25b   : > { %2076 = vmatprep.mubr.msk.bf16.mxu0 %vm2452_vm4, %v1782_v38  ;;  %2096 = vmatprep.mubr.msk.bf16.mxu1 %vm2452_vm4, %v1782_v38 }
 0x25c   : > { %2077 = vmatmul.mubr.msk.bf16.vlgmr.msra.gmra.mrb[12].mxu0 %vm2459_vm5, %v1785_v39  ;;  %2097 = vmatmul.mubr.msk.bf16.vlgmr.msra.gmra.mrb[12].mxu1 %vm2459_vm5, %v1785_v39 }
 0x25d   : > { %2101 = vmatpush3.bf16.msra.mxu0 %v2548_v34  ;;  %2116 = vmatprep.mubr.msk.bf16.mxu0 %vm2452_vm4, %v1782_v38  ;;  %v2203_v34 = vld [vmem:[%s2622_s5 + $0xa0] sm:$0xff]   ;;  %vm2648_vm4 = vmmov %vm2640_vm8 }
 0x25e   : > { %2102 = vmatprep.subr.bf16.mxu0 %v2200_v40 }
 0x261   : > { %2103 = vmatpush3.bf16.msra.mxu0 %v2200_v40 }
 0x262   : > { %2104 = vmatprep.subr.bf16.mxu0 %v2201_v41 }
 0x265   : > { %2105 = vmatpush3.bf16.msra.mxu0 %v2201_v41 }
 0x266   : > { %2106 = vmatprep.subr.bf16.mxu0 %v2202_v42 }
 0x269   : > { %2107 = vmatpush3.bf16.msra.mxu0 %v2202_v42 }
 0x26a   : > { %2108 = vmatprep.subr.bf16.mxu0 %v2203_v34 }
 0x26d   : > { %2109 = vmatpush3.bf16.msra.mxu0 %v2203_v34 }
 0x26e   : > { %2110 = vmatprep.subr.bf16.mxu0 %v2204_v8 }
 0x271   : > { %2111 = vmatpush3.bf16.msra.mxu0 %v2204_v8 }
 0x272   : > { %2112 = vmatprep.subr.bf16.mxu0 %v2205_v43 }
 0x275   : > { %2113 = vmatpush3.bf16.msra.mxu0 %v2205_v43 }
 0x276   : > { %2114 = vmatprep.subr.bf16.mxu0 %v2206_v44 }
 0x279   : > { %2115 = vmatpush3.bf16.msra.mxu0 %v2206_v44 }
 0x27c   : > { %2117 = vmatmul.mubr.msk.bf16.vlgmr.msra.gmra.mrb[16].mxu0 %vm2459_vm5, %v1785_v39 }
 0x32f   : > { %v2078_v46 = vpop.f32.mrb[12].mxu0  ;;  %v2098_v47 = vpop.f32.mrb[12].mxu1 }
 0x330   : > { %v1266_v48 = vpop.f32.mrb[13].mxu0  ;;  %v1391_v49 = vpop.f32.mrb[13].mxu1  ;;  %v1286_v55 = vrot.slane %v2078_v46, 7 }
 0x331   : > { %v1283_v50 = vrot.slane %v1266_v48, 7  ;;  %v2079_v51 = vpop.f32.mrb[14].mxu0  ;;  %v2099_v52 = vpop.f32.mrb[14].mxu1 }
 0x332   : > { %v1269_v53 = vpop.f32.mrb[15].mxu0  ;;  %v1394_v54 = vpop.f32.mrb[15].mxu1 }
 0x333   : > { %v1291_v56 = vsel %vm2643_vm11, 0.0, %v1283_v50  ;;  %v1284_v57 = vrot.slane %v1269_v53, 7 }
 0x334   : > { %v1405_v58 = vadd.f32 %v1391_v49, %v1291_v56 }
 0x335   : > { %v1287_v59 = vsel %vm2644_vm12, %v1284_v57, %v1286_v55  ;;  %v1285_v60 = vsel %vm2645_vm13, %v1283_v50, %v1284_v57 }
 0x336   : > { %v1406_v10 = vadd.f32 %v1394_v54, %v1285_v60  ;;  %v1407_v61 = vadd.f32 %v2098_v47, %v1287_v59 }
 0x34f   : > { %v2118_v63 = vpop.f32.mrb[16].mxu0 }
 0x350   : > { %v1527_v0 = vrot.slane %v2118_v63, 1  ;;  %v1507_v2 = vpop.f32.mrb[17].mxu0 }
 0x351   : > { %v2119_v3 = vpop.f32.mrb[18].mxu0  ;;  %v1524_v11 = vrot.slane %v1507_v2, 1 }
 0x352   : > { %v1532_v4 = vsel %vm2646_vm14, %v1527_v0, 0.0  ;;  %v1510_v7 = vpop.f32.mrb[19].mxu0 }
 0x353   : > { %v1535_v9 = vadd.f32 %v1532_v4, %v1407_v61  ;;  %v1525_v12 = vrot.slane %v1510_v7, 1 }
 0x355   : > { %v1545_v13 = vadd.f32 %v1847_v6, %v1535_v9  ;;  %v1526_v14 = vsel %vm2647_vm15, %v1524_v11, %v1525_v12  ;;  %v1528_v45 = vsel %vm2648_vm4, %v1525_v12, %v1527_v0 }
 0x356   : > { %v1533_v15 = vadd.f32 %v1526_v14, %v1405_v58  ;;  %v1534_v16 = vadd.f32 %v1528_v45, %v1406_v10 }
 0x357   : > { %v1551_v17 = vmul.f32 %v1545_v13, %v1545_v13  ;;  %v1548_v36 = vmul.f32 0.5, %v1545_v13 }
 0x358   : > { %v1543_v18 = vadd.f32 %v1847_v6, %v1533_v15  ;;  %v1544_v19 = vadd.f32 %v1847_v6, %v1534_v16 }
 0x359   : > { %v1554_v20 = vmul.f32 %v1551_v17, %v1545_v13 }
 0x35a   : > { %v1549_v21 = vmul.f32 %v1543_v18, %v1543_v18  ;;  %v1550_v22 = vmul.f32 %v1544_v19, %v1544_v19  ;;  %v1546_v41 = vmul.f32 0.5, %v1543_v18  ;;  %v1547_v8 = vmul.f32 0.5, %v1544_v19 }
 0x35b   : > { %v1557_v23 = vmul.f32 0.044715, %v1554_v20 }
 0x35c   : > { %v1552_v24 = vmul.f32 %v1549_v21, %v1543_v18  ;;  %v1553_v25 = vmul.f32 %v1550_v22, %v1544_v19 }
 0x35d   : > { %v1560_v26 = vadd.f32 %v1557_v23, %v1545_v13 }
 0x35e   : > { %v1555_v27 = vmul.f32 0.044715, %v1552_v24  ;;  %v1556_v28 = vmul.f32 0.044715, %v1553_v25 }
 0x35f   : > { %v1563_v29 = vmul.f32 0.7978846, %v1560_v26 }
 0x360   : > { %v1558_v30 = vadd.f32 %v1555_v27, %v1543_v18  ;;  %v1559_v31 = vadd.f32 %v1556_v28, %v1544_v19 }
 0x361   : > { %2219 = vtanh.f32 %v1563_v29 }
 0x362   : > { %v1561_v32 = vmul.f32 0.7978846, %v1558_v30  ;;  %v1562_v33 = vmul.f32 0.7978846, %v1559_v31 }
 0x364   : > { %2221 = vtanh.f32 %v1561_v32 }
 0x365   : > { %2223 = vtanh.f32 %v1562_v33 }
 0x36b   : > { %v2220_v35 = vpop.eup %2219 }
 0x36c   : > { %v1569_v37 = vadd.f32 1.0, %v2220_v35 }
 0x36e   : > { %v2222_v38 = vpop.eup %2221  ;;  %v1572_v39 = vmul.f32 %v1569_v37, %v1548_v36 }
 0x36f   : > { %v2224_v40 = vpop.eup %2223  ;;  %v1567_v42 = vadd.f32 1.0, %v2222_v38 }
 0x370   : > { %v1575_v34 = vsel %vm2444_vm3, %v1572_v39, 0.0  ;;  %v1568_v43 = vadd.f32 1.0, %v2224_v40 }
 0x371   : > { %1578 = vst [vmem:[%s278_s19 + $0x10] sm:$0xff] %v1575_v34  ;;  %v1570_v44 = vmul.f32 %v1567_v42, %v1546_v41 }
 0x372   : > { %v1571_v46 = vmul.f32 %v1568_v43, %v1547_v8 }
 0x373   : > { %v1573_v47 = vsel %vm2436_vm0, %v1570_v44, 0.0 }
 0x374   : > { %v1574_v48 = vsel %vm2440_vm2, %v1571_v46, 0.0  ;;  %1576 = vst [vmem:[%s278_s19] sm:$0xff] %v1573_v47 }
 0x375   : > { %1577 = vst [vmem:[%s278_s19 + $0x8] sm:$0xff] %v1574_v48 }
 0x376 PF: > { %s17_s24 = sadd.s32 1, %s2231_s24  }
 0x377   : > { %p14_p4 = scmp.ge.s32.totalorder %s17_s24, 4  }
 0x379   :  { %16 = sbr.rel (!%p14_p4) target bundleno = 1 (0x1), region = 84 }

</bundles_post_ra>
